<compile_context>
chip_gen: v7x
topology: tpu7x:2x2x1
jax: 0.10.0
libtpu: 0.0.40
codegen_flags: <defaults>
</compile_context>

<pallas_src>
from collections import namedtuple
from functools import partial
from typing import List

import jax
import jax.numpy as jnp
from jax.experimental import pallas as pl
from jax.experimental.pallas import tpu as pltpu

_LANE = 128
_SUBLANE = 8
_TARGET_BLOCK_BYTES = 2 * 1024 * 1024   # ~2 MiB per x / out block (mem-bound sweet spot)
_MIN_GRID_STEPS = 8                     # >= 2 * num_TensorCores on every generation


def _round_up(x: int, m: int) -> int:
    return ((x + m - 1) // m) * m


def _round_down(x: int, m: int) -> int:
    return max(m, (x // m) * m)


def _vmem_capacity_bytes() -> int:
    try:
        return int(pltpu.get_tpu_info().vmem_capacity_bytes)
    except Exception:
        return 64 * 1024 * 1024         # conservative: v7x per-TC VMEM


# ----------------------------------------------------------------------------
# Pallas kernel: fused 1x1-conv-as-matmul + bias  (the "engine" hot path)
# ----------------------------------------------------------------------------
def _conv1x1_kernel(w_ref, b_ref, x_ref, o_ref, acc_ref):
    # w_ref:   (K, t_c)      weight tile (resident when n_c == 1)
    # b_ref:   (K, 1)        bias column, broadcast along lanes
    # x_ref:   (t_c, t_hw)   activations, channel-major (native NCHW view)
    # o_ref:   (K, t_hw)     output tile, lane-dense (t_hw multiple of 128)
    # acc_ref: (K, t_hw) f32 VMEM accumulator across the C-reduction axis
    k = pl.program_id(2)

    @pl.when(k == 0)
    def _():
        acc_ref[...] = jnp.zeros_like(acc_ref)

    acc_ref[...] += jnp.dot(w_ref[...], x_ref[...],
                            preferred_element_type=jnp.float32)

    @pl.when(k == pl.num_programs(2) - 1)
    def _():
        o_ref[...] = (acc_ref[...] + b_ref[...]).astype(o_ref.dtype)


def conv1x1_pallas(x_nchw: jax.Array, w_kc: jax.Array, b_k: jax.Array) -> jax.Array:
    """1x1 convolution + bias in native NCHW layout.

    x: (N, C, H, W) f32,  w: (K, C),  b: (K,)  ->  (N, K, H, W)

    out[n] = W(K,C) @ X[n](C, H*W) + b : no transpose passes, lane-dense output.
    """
    N, C, H, W = x_nchw.shape
    K = w_kc.shape[0]
    HW = H * W
    itemsize = jnp.dtype(jnp.float32).itemsize

    x = x_nchw.reshape(N, C, HW)          # free view (row-major), no HBM pass
    w = w_kc.astype(jnp.float32)
    b = b_k.reshape(K, 1).astype(jnp.float32)
    # NOTE(dtypes): for real engine sizes, store w in bf16 at init and take x
    # in bf16 *from the producer* (keep preferred_element_type=f32 in the dot)
    # to halve the dominant HBM stream; emit bf16 output if the consumer
    # accepts it. int8 weights+activations halve bytes again on v5e/v6e only
    # (v7x MXU is fp8-only, no int). Casting f32->bf16 here in the wrapper
    # would just add an extra un-hidden HBM pass, so it is not done.

    # ---- HW tile selection: always a multiple of 128 (masked tail only on
    # the final block), sized for ~2 MiB x+out slabs, and small enough that
    # the grid has >= _MIN_GRID_STEPS balanced "parallel" steps (megacore
    # sharding on v7x + DMA/compute overlap even for N=1 deployment).
    hw_padded = _round_up(HW, _LANE)
    bytes_per_col = (C + K) * itemsize
    t_hw = min(hw_padded,
               _round_down(_TARGET_BLOCK_BYTES // max(bytes_per_col, 1), _LANE))
    while N * pl.cdiv(HW, t_hw) < _MIN_GRID_STEPS and t_hw > _LANE:
        t_hw = _round_down(t_hw // 2, _LANE)
    n_hw = pl.cdiv(HW, t_hw)

    # ---- C (contraction) tiling: only kicks in when a full-C x block would
    # exceed the per-block budget. t_c must be a multiple of 128 when tiled
    # (it is the lane dim of the weight block); otherwise use full C.
    t_c = C
    if C % _LANE == 0 and C * t_hw * itemsize > _TARGET_BLOCK_BYTES:
        t_c = min(C, _round_down(_TARGET_BLOCK_BYTES // (t_hw * itemsize), _LANE))
    n_c = pl.cdiv(C, t_c)

    # ---- VMEM budget + limit (double-buffered blocks + resident accumulator),
    # capped below the physical capacity of the current generation.
    vmem_cap = _vmem_capacity_bytes()
    needed = (2 * (t_c * t_hw + K * t_hw + K * t_c + K) * itemsize   # dbl-buffered blocks
              + K * t_hw * 4)                                        # f32 accumulator
    vmem_limit = int(min(0.9 * vmem_cap, max(2 * needed, 16 * 1024 * 1024)))

    grid = (N, n_hw, n_c)   # reduction axis last, marked "arbitrary"

    cost = pl.CostEstimate(
        flops=2 * N * K * C * HW,
        transcendentals=0,
        bytes_accessed=(N * C * HW + K * C + K + N * K * HW) * itemsize)

    out = pl.pallas_call(
        _conv1x1_kernel,
        out_shape=jax.ShapeDtypeStruct((N, K, HW), jnp.float32),
        grid_spec=pltpu.PrefetchScalarGridSpec(
            num_scalar_prefetch=0,
            grid=grid,
            in_specs=[
                pl.BlockSpec((K, t_c), lambda n, j, k: (0, k)),          # weight
                pl.BlockSpec((K, 1), lambda n, j, k: (0, 0)),            # bias col
                pl.BlockSpec((None, t_c, t_hw), lambda n, j, k: (n, k, j)),  # x tile
            ],
            out_specs=pl.BlockSpec((None, K, t_hw), lambda n, j, k: (n, 0, j)),
            scratch_shapes=[pltpu.VMEM((K, t_hw), jnp.float32)],
        ),
        compiler_params=pltpu.CompilerParams(
            dimension_semantics=("parallel", "parallel", "arbitrary"),
            vmem_limit_bytes=vmem_limit),
        cost_estimate=cost,
    )(w, b, x)

    return out.reshape(N, K, H, W)         # free view back to NCHW


# ----------------------------------------------------------------------------
# TRTWrapper equivalent
# ----------------------------------------------------------------------------
Binding = namedtuple("Binding", ("name", "dtype", "shape"))


class TRTWrapper:
    """JAX/Pallas stand-in for mmyolo's TRTWrapper."""

    # TODO(synk): real TRT engine deserialization (runtime.deserialize_cuda_engine,
    # execution contexts, CUDA streams, device-pointer bindings) has no Pallas
    # equivalent; replaced with a fixed synthetic engine (1x1 conv head) whose
    # execution is the Pallas kernel above.

    def __init__(self, in_shape=(2, 4, 16, 16), out_channels=8):
        N, C, H, W = in_shape
        self.is_dynamic = False

        # Engine bindings (one input, one output), mirroring __init_bindings.
        self.input_names: List[str] = ["images"]
        self.output_names: List[str] = ["output"]
        self.num_inputs = len(self.input_names)
        self.num_outputs = len(self.output_names)
        self.num_bindings = self.num_inputs + self.num_outputs
        self.bindings: List[int] = [0] * self.num_bindings

        self.inputs_info = [Binding("images", jnp.float32, (N, C, H, W))]
        self.outputs_info = [Binding("output", jnp.float32, (N, out_channels, H, W))]
        self.output_dtypes = [jnp.float32]

        # Deterministic "engine weights", stored (K, C) so the kernel computes
        # W @ X directly in native NCHW layout.  (For real engine sizes store
        # these in bf16 — see dtype NOTE in conv1x1_pallas.)
        kw, kb = jax.random.split(jax.random.PRNGKey(42))
        self.weight_kc = jax.random.normal(kw, (out_channels, C), jnp.float32) * 0.1
        self.bias_k = jax.random.normal(kb, (out_channels,), jnp.float32) * 0.1

        # TODO(synk): TRT's static-shape output pre-allocation (output_tensor
        # buffers bound by device pointer) has no JAX analogue; XLA allocates
        # the kernel outputs, so no dead pre-allocation is kept here.

        self._engine = jax.jit(
            partial(conv1x1_pallas, w_kc=self.weight_kc, b_k=self.bias_k))

    def __call__(self, *inputs):
        return self.forward(*inputs)

    def forward(self, *inputs):
        assert len(inputs) == self.num_inputs
        # torch ".contiguous()" equivalent: ensure concrete row-major arrays.
        contiguous_inputs = [jnp.asarray(i) for i in inputs]

        for i in range(self.num_inputs):
            exp_shape = self.inputs_info[i].shape
            assert tuple(contiguous_inputs[i].shape) == exp_shape, (
                f"binding {i} shape mismatch: {contiguous_inputs[i].shape} "
                f"vs {exp_shape}")

        # "execute_async_v2 + stream.synchronize()"
        outputs = [self._engine(contiguous_inputs[0])]

        OutputType = namedtuple(
            "OutputType",
            tuple(
                name.replace(":", "_")
                if not name[0].isdigit() and name[0] != "_"
                else "name_" + name
                for name in self.output_names
            ),
        )
        return OutputType(*outputs)


# ----------------------------------------------------------------------------
# Pure-JAX reference for verification
# ----------------------------------------------------------------------------
def _ref_conv1x1(x_nchw, w_kc, b_k):
    y = jnp.einsum("nchw,kc->nkhw", x_nchw, w_kc,
                   precision=jax.lax.Precision.HIGHEST)
    return y + b_k[None, :, None, None]


if __name__ == "__main__":
    key = jax.random.PRNGKey(0)
    N, C, H, W = 2, 4, 16, 16
    K = 8
    x = jax.random.normal(key, (N, C, H, W), jnp.float32)

    wrapper = TRTWrapper(in_shape=(N, C, H, W), out_channels=K)
    out = wrapper(x)
    y = jax.block_until_ready(out.output)

    y_ref = _ref_conv1x1(x, wrapper.weight_kc, wrapper.bias_k)
    assert y.shape == (N, K, H, W), y.shape
    assert jnp.allclose(y, y_ref, atol=5e-3, rtol=5e-3), (
        "mismatch vs reference: max abs err "
        f"{jnp.max(jnp.abs(y - y_ref))}")

    print("KERNEL_OK")
</pallas_src>

<mosaic_0001>
module attributes {stable_mosaic.version = 11 : i64} {
  func.func @_conv1x1_kernel(%arg0: i32, %arg1: i32, %arg2: i32, %arg3: memref<8x4xf32, #tpu.memory_space<vmem>>, %arg4: memref<8x1xf32, #tpu.memory_space<vmem>>, %arg5: memref<1x4x128xf32, #tpu.memory_space<vmem>>, %arg6: memref<1x8x128xf32, #tpu.memory_space<vmem>>, %arg7: memref<8x128xf32, #tpu.memory_space<vmem>>) attributes {dimension_semantics = [#tpu.dimension_semantics<parallel>, #tpu.dimension_semantics<parallel>, #tpu.dimension_semantics<arbitrary>], iteration_bounds = array<i64: 2, 2, 1>, scalar_prefetch = 0 : i64, scratch_operands = 1 : i64, tpu.core_type = #tpu.core_type<tc>, window_params = [{transform_indices = @transform_0, window_bounds = array<i64: 8, 4>}, {pipeline_mode = #tpu.pipeline_mode<synchronous>, transform_indices = @transform_1, window_bounds = array<i64: 8, 1>}, {transform_indices = @transform_2, window_bounds = array<i64: 1, 4, 128>}, {transform_indices = @transform_3, window_bounds = array<i64: 1, 8, 128>}]} {
    %c0_i32 = arith.constant 0 : i32
    %0 = arith.cmpi eq, %arg2, %c0_i32 : i32
    %1 = arith.extui %0 : i1 to i32
    %c0_i32_0 = arith.constant 0 : i32
    %2 = arith.cmpi ne, %1, %c0_i32_0 : i32
    scf.if %2 {
      %cst_11 = arith.constant 0.000000e+00 : f32
      %13 = vector.broadcast %cst_11 : f32 to vector<8x128xf32>
      %c0_12 = arith.constant 0 : index
      %c0_13 = arith.constant 0 : index
      %14 = vector.load %arg7[%c0_12, %c0_13] : memref<8x128xf32, #tpu.memory_space<vmem>>, vector<8x128xf32>
      tpu.vector_store %arg7[%c0_12, %c0_13], %13 {strides = array<i32>} : memref<8x128xf32, #tpu.memory_space<vmem>>, vector<8x128xf32>,
    } else {
    }
    %c0 = arith.constant 0 : index
    %c0_1 = arith.constant 0 : index
    %3 = vector.load %arg7[%c0, %c0_1] : memref<8x128xf32, #tpu.memory_space<vmem>>, vector<8x128xf32>
    %c0_2 = arith.constant 0 : index
    %c0_3 = arith.constant 0 : index
    %4 = vector.load %arg3[%c0_2, %c0_3] : memref<8x4xf32, #tpu.memory_space<vmem>>, vector<8x4xf32>
    %c0_4 = arith.constant 0 : index
    %c0_5 = arith.constant 0 : index
    %c0_6 = arith.constant 0 : index
    %5 = vector.load %arg5[%c0_4, %c0_5, %c0_6] : memref<1x4x128xf32, #tpu.memory_space<vmem>>, vector<1x4x128xf32>
    %6 = vector.shape_cast %5 : vector<1x4x128xf32> to vector<4x128xf32>
    %cst = arith.constant dense<0.000000e+00> : vector<8x128xf32>
    %7 = tpu.matmul %4, %6, %cst {dimension_numbers = #tpu.dot_dimension_numbers<[1], [0], [0], [1], [0, 0, 1, 1], [], []>} : vector<8x4xf32>, vector<4x128xf32>, vector<8x128xf32> -> vector<8x128xf32>
    %8 = arith.addf %3, %7 : vector<8x128xf32>
    %c0_7 = arith.constant 0 : index
    %c0_8 = arith.constant 0 : index
    %9 = vector.load %arg7[%c0_7, %c0_8] : memref<8x128xf32, #tpu.memory_space<vmem>>, vector<8x128xf32>
    tpu.vector_store %arg7[%c0_7, %c0_8], %8 {strides = array<i32>} : memref<8x128xf32, #tpu.memory_space<vmem>>, vector<8x128xf32>,
    %c0_i32_9 = arith.constant 0 : i32
    %10 = arith.cmpi eq, %arg2, %c0_i32_9 : i32
    %11 = arith.extui %10 : i1 to i32
    %c0_i32_10 = arith.constant 0 : i32
    %12 = arith.cmpi ne, %11, %c0_i32_10 : i32
    scf.if %12 {
      %c0_11 = arith.constant 0 : index
      %c0_12 = arith.constant 0 : index
      %13 = vector.load %arg7[%c0_11, %c0_12] : memref<8x128xf32, #tpu.memory_space<vmem>>, vector<8x128xf32>
      %c0_13 = arith.constant 0 : index
      %c0_14 = arith.constant 0 : index
      %14 = vector.load %arg4[%c0_13, %c0_14] : memref<8x1xf32, #tpu.memory_space<vmem>>, vector<8x1xf32>
      %15 = vector.broadcast %14 : vector<8x1xf32> to vector<8x128xf32>
      %16 = arith.addf %13, %15 : vector<8x128xf32>
      %c0_15 = arith.constant 0 : index
      %c0_16 = arith.constant 0 : index
      %c0_17 = arith.constant 0 : index
      %17 = vector.load %arg6[%c0_15, %c0_16, %c0_17] : memref<1x8x128xf32, #tpu.memory_space<vmem>>, vector<1x8x128xf32>
      %18 = vector.shape_cast %17 : vector<1x8x128xf32> to vector<8x128xf32>
      %19 = vector.shape_cast %16 : vector<8x128xf32> to vector<1x8x128xf32>
      tpu.vector_store %arg6[%c0_15, %c0_16, %c0_17], %19 {strides = array<i32>} : memref<1x8x128xf32, #tpu.memory_space<vmem>>, vector<1x8x128xf32>,
    } else {
    }
    return
  }
  func.func @transform_0(%arg0: i32, %arg1: i32, %arg2: i32) -> (i32, i32) {
    %c0_i32 = arith.constant 0 : i32
    %c0_i32_0 = arith.constant 0 : i32
    return %c0_i32, %arg2 : i32, i32
  }
  func.func @transform_1(%arg0: i32, %arg1: i32, %arg2: i32) -> (i32, i32) {
    %c0_i32 = arith.constant 0 : i32
    %c0_i32_0 = arith.constant 0 : i32
    %c0_i32_1 = arith.constant 0 : i32
    return %c0_i32, %c0_i32_0 : i32, i32
  }
  func.func @transform_2(%arg0: i32, %arg1: i32, %arg2: i32) -> (i32, i32, i32) {
    %c0_i32 = arith.constant 0 : i32
    return %arg0, %arg2, %arg1 : i32, i32, i32
  }
  func.func @transform_3(%arg0: i32, %arg1: i32, %arg2: i32) -> (i32, i32, i32) {
    %c0_i32 = arith.constant 0 : i32
    %c0_i32_0 = arith.constant 0 : i32
    return %arg0, %c0_i32, %arg1 : i32, i32, i32
  }
}

</mosaic_0001>

<bundles_post_ra>
// kernel: conv1x1_pallas.1
= control target key start
LH: loop header
LB: loop body
LE: loop exit
PB: predicated region body
PF: predicated region fallthrough
CT: control target
= control target key end

     0   :  { %s579_s12 = smov 0   ;;  %s581_s13 = smov 0   ;;  %s636_s0 = inlined_call_operand.vmem [shape: f32[8,4], index: 0, kind: input, shape index: {}]   ;;  %s637_s1 = inlined_call_operand.vmem [shape: f32[8,1], index: 1, kind: input, shape index: {}]   ;;  %s638_s2 = inlined_call_operand.vmem [shape: f32[2,4,256], index: 2, kind: input, shape index: {}]   ;;  %s639_s3 = inlined_call_operand.vmem [shape: f32[2,8,256], index: 3, kind: output, shape index: {}]  }
   0x1   :  { %s583_s14 = smov 0   ;;  %s585_s15 = smov 0  }
   0x2   :  { %s587_s16 = smov 0  }
   0x3 LB: > { %s28_s17 = sadd.s32 1, %s546_s14  ;;  %s32_s18 = sadd.s32 1, %s550_s15  ;;  %s554_s16 = sphi %s587_s16, %s13_s16   ;;  %s550_s15 = sphi %s585_s15, %s643_s15   ;;  %s546_s14 = sphi %s583_s14, %s642_s14   ;;  %s542_s13 = sphi %s581_s13, %s641_s13   ;;  %s538_s12 = sphi %s579_s12, %s640_s12  }
   0x4   : > { %p30_p0 = scmp.ge.s32.totalorder %s28_s17, 2  ;;  %p456_p1 = scmp.ge.s32.totalorder %s554_s16, 1 }
   0x5   : > { %p178_p2 = scmp.lt.s32.totalorder %s554_s16, 5 }
   0x6   : > { %s645_s17 = smov (%p30_p0, %s28_s17), 0  ;;  %s647_s18 = smov (!%p30_p0, %s32_s18), %s550_s15 }
   0x7   : > { %p179_p3 = pnand %p456_p1, %p178_p2  ;;  %p34_p4 = scmp.ge.s32.totalorder %s647_s18, 2 }
   0x8   : > { %p220_p5 = scmp.lt.s32.totalorder (!%p179_p3), %s542_s13, 1  ;;  %p224_p6 = scmp.lt.s32.totalorder (!%p179_p3), %s538_s12, 1  ;;  %v556_v0 = vmov (!%p179_p3), 0.0   ;;  %vm557_vm0 = vmmov (!%p179_p3), 0   ;;  %v332_v1 = vld [vmem:[%s637_s1] sm:$0xff] (!%p179_p3)  ;;  %v558_v2 = vmov (!%p179_p3), 0  }
   0x9   : > { %s649_s18 = smov (%p34_p4, %s647_s18), 0  ;;  %182 = sbr.rel (%p179_p3) target bundleno = 238 (0xee), region = 32 }
   0xa   : > { %467 = vmatprep.subr.mxu0 (!%p179_p3), %v556_v0  ;;  %469 = vmatprep.mubr.msk.f32.mxu0 (!%p179_p3), %vm557_vm0, %v556_v0  ;;  %vm252_vm1 = vcmask (!%p179_p3), 1043456   ;;  %v246_v3 = vld [vmem:[%s636_s0] sm:$0xff] (!%p179_p3)  ;;  %vm248_vm2 = vcmask (!%p179_p3), 31744  }
   0xb   : > { %515 = vset.pattern.permute.xlu0 (!%p179_p3), %v558_v2 }
   0xc   : > { %335 = vperm.xlu0 (!%p179_p3), %515, %v332_v1  }
  0x10   : > { %s651_s13 = smov (!%p220_p5, %s542_s13), 1  ;;  %s653_s12 = smov (!%p224_p6, %s538_s12), 1 }
  0x11   : > { %s457_s21 = sshll.u32 %s651_s13, 1 }
  0x12   : > { %s229_s22 = sadd.s32 %s457_s21, %s653_s12 }
  0x13   : > { %s458_s23 = sshll.u32 %s229_s22, 2  ;;  %s460_s29 = sshll.u32 %s229_s22, 3 }
  0x14   : > { %s231_s26 = scalar_lea.vmem %s638_s2, %s458_s23  ;;  %s239_s5 = scalar_lea.vmem %s639_s3, %s460_s29 }
  0x15   : > { %v247_v4 = vld [vmem:[%s231_s26] sm:$0xf] }
  0x16   : > { %468 = vmatpush3.msk.msra.mxu0 %vm252_vm1, %v247_v4 }
  0x17   : > { %470 = vmatmul.mubr.msk.f32.vlgmr.msra.gmra.mrb[0].mxu0 %vm248_vm2, %v246_v3 }
  0x8b   : > { %v336_v5 = vpop.permute.xlu0 %335 }
  0xea   : > { %v322_v6 = vpop.f32.mrb[0].mxu0 }
  0xeb   : > { %v338_v7 = vadd.f32 %v336_v5, %v322_v6  ;;  %v471_v8 = vpop.f32.mrb[1].mxu0 }
  0xed   : > { %339 = vst [vmem:[%s239_s5] sm:$0xff] %v338_v7 }
  0xee PF: > { %s13_s16 = sadd.s32 1, %s554_s16   ;;  %s640_s12 = smov %s546_s14 }
  0xef   : > { %p10_p7 = scmp.ge.s32.totalorder %s13_s16, 6   ;;  %s641_s13 = smov %s550_s15 }
  0xf0   : > { %s642_s14 = smov %s645_s17  ;;  %s643_s15 = smov %s649_s18 }
  0xf1   :  { %12 = sbr.rel (!%p10_p7) target bundleno = 3 (0x3), region = 73 }

</bundles_post_ra>
